<compile_context>
chip_gen: v7x
topology: tpu7x:2x2x1
jax: 0.10.0
libtpu: 0.0.40
codegen_flags: <defaults>
</compile_context>

<pallas_src>
import functools

import jax
import jax.numpy as jnp
from jax import lax
from jax.experimental import pallas as pl
from jax.experimental.pallas import tpu as pltpu

MARGIN = 2.0
EPS = 1e-6                      # F.pairwise_distance default eps (added to the diff)
_BLOCK_BUDGET_BYTES = 4 << 20   # target bytes per (tile_b, D) input block


def _contrastive_loss_kernel(o1_ref, o2_ref, label_ref, out_ref, *,
                             batch, tile_b, tiles_per_core, margin, masked):
    t = pl.program_id(1)                      # tile index within this batch half

    @pl.when(t == 0)
    def _():                                  # per-core accumulator init
        out_ref[...] = jnp.zeros_like(out_ref)

    o1 = o1_ref[...].astype(jnp.float32)
    o2 = o2_ref[...].astype(jnp.float32)
    label = label_ref[...].astype(jnp.float32)                # (tile_b, 1)

    # F.pairwise_distance: ||x1 - x2 + eps||_2 along last dim, keepdim=True.
    diff = o1 - o2 + EPS                                      # (tile_b, D)  VPU
    dist_sq = jnp.sum(diff * diff, axis=-1, keepdims=True)    # (tile_b, 1)  XLU
    hinge = jnp.maximum(margin - jnp.sqrt(dist_sq), 0.0)      # sqrt on EUP
    # (1-label)*d^2 + label*h^2 == d^2 + label*(h^2 - d^2): linear in label so
    # non-binary labels match the PyTorch module; fused form keeps fewer
    # (tile_b, 1) column temps live.
    per_row = dist_sq + label * (hinge * hinge - dist_sq)     # (tile_b, 1)

    if masked:
        # Rows past the true batch (last partial tile, or the duplicated
        # clamped overflow tile on the second half) must contribute zero.
        # Use a select (not multiply): padded rows may hold garbage.
        c = pl.program_id(0)
        global_tile = c * tiles_per_core + t
        row_ids = global_tile * tile_b + lax.broadcasted_iota(
            jnp.int32, (tile_b, 1), 0)
        per_row = jnp.where(row_ids < batch, per_row, 0.0)

    # Accumulate directly into the resident (1,1,1) output block for this core.
    out_ref[...] += jnp.sum(per_row, keepdims=True)[None]


def contrastive_loss(output1, output2, label, *, margin=MARGIN, tile_b=None):
    """output1, output2: (B, D) float (f32 or bf16); label: (B, 1). Scalar loss."""
    B, D = output1.shape
    assert output2.shape == (B, D)
    assert label.shape == (B, 1)
    itemsize = jnp.dtype(output1.dtype).itemsize
    lbl_itemsize = jnp.dtype(label.dtype).itemsize

    if tile_b is None:
        # ~4 MiB per (tile_b, D) input block, multiple of 8, capped at the
        # 8-rounded half-batch so both halves of the leading grid axis work.
        tile_b = max(8, (_BLOCK_BUDGET_BYTES // max(D * itemsize, 1)) // 8 * 8)
        half_b = ((-(-B // 2)) + 7) // 8 * 8
        tile_b = max(8, min(tile_b, half_b))
    assert tile_b % 8 == 0 and tile_b > 0

    total_tiles = pl.cdiv(B, tile_b)            # real tiles covering the batch
    tiles_per_core = pl.cdiv(total_tiles, 2)    # tiles per half of leading axis
    masked = (2 * tiles_per_core * tile_b != B)

    def in_map(c, t):
        # Clamp so the (possibly duplicated) overflow slot on the second half
        # never DMAs past the array; its rows are masked to zero in the kernel.
        return (jnp.minimum(c * tiles_per_core + t, total_tiles - 1), 0)

    # Scoped-VMEM for this tile: 2 inputs x 2 buffers (+ labels + 50% slack),
    # floored at the v5e default (16 MiB), capped well under v7x's 64 MiB.
    vmem_need = 2 * 2 * tile_b * D * itemsize + 2 * tile_b * lbl_itemsize
    vmem_limit = int(min(48 << 20,
                         max(16 << 20, vmem_need + vmem_need // 2 + (2 << 20))))

    kernel = functools.partial(
        _contrastive_loss_kernel, batch=B, tile_b=tile_b,
        tiles_per_core=tiles_per_core, margin=float(margin), masked=masked)

    partials = pl.pallas_call(
        kernel,
        out_shape=jax.ShapeDtypeStruct((2, 1, 1), jnp.float32),
        grid=(2, tiles_per_core),
        in_specs=[
            pl.BlockSpec((tile_b, D), in_map),   # output1 tile
            pl.BlockSpec((tile_b, D), in_map),   # output2 tile
            pl.BlockSpec((tile_b, 1), in_map),   # label tile
        ],
        out_specs=pl.BlockSpec((1, 1, 1), lambda c, t: (c, 0, 0)),  # per-core partial
        compiler_params=pltpu.CompilerParams(
            dimension_semantics=("parallel", "arbitrary"),
            vmem_limit_bytes=vmem_limit),
        cost_estimate=pl.CostEstimate(
            flops=4 * B * D + 8 * B,
            transcendentals=B,
            bytes_accessed=2 * B * D * itemsize + B * lbl_itemsize + 8),
    )(output1, output2, label)

    # Sum the two per-core partial sums and take the mean over the true batch.
    return (partials[0, 0, 0] + partials[1, 0, 0]) / B


def _reference_loss(a, b, l, margin=MARGIN):
    a = a.astype(jnp.float32)
    b = b.astype(jnp.float32)
    d = jnp.sqrt(jnp.sum((a - b + EPS) ** 2, axis=-1, keepdims=True))
    return jnp.mean((1.0 - l) * d ** 2
                    + l * jnp.maximum(margin - d, 0.0) ** 2)


if __name__ == "__main__":
    key = jax.random.PRNGKey(0)
    k1, k2, k3 = jax.random.split(key, 3)

    # Test 1: f32, B not tile-aligned -> exercises multi-tile accumulation,
    # last-tile masking and the clamped overflow slot (tile_b=8 -> grid (2, 2)).
    B, D = 20, 32
    o1 = jax.random.normal(k1, (B, D), dtype=jnp.float32)
    o2 = jax.random.normal(k2, (B, D), dtype=jnp.float32)
    lbl = jax.random.bernoulli(k3, 0.5, (B, 1)).astype(jnp.float32)

    loss = contrastive_loss(o1, o2, lbl, tile_b=8)
    jax.block_until_ready(loss)
    ref = _reference_loss(o1, o2, lbl)
    assert jnp.allclose(loss, ref, rtol=1e-5, atol=1e-5), (loss, ref)

    # Test 2: bf16 inputs (halved HBM traffic), tile-aligned batch -> mask-free
    # path with the auto-derived tile; kernel upcasts to f32 post-DMA.
    B2, D2 = 32, 64
    o1b = jax.random.normal(k1, (B2, D2), dtype=jnp.bfloat16)
    o2b = jax.random.normal(k2, (B2, D2), dtype=jnp.bfloat16)
    lbl2 = jax.random.bernoulli(k3, 0.5, (B2, 1)).astype(jnp.float32)

    loss2 = contrastive_loss(o1b, o2b, lbl2)
    jax.block_until_ready(loss2)
    ref2 = _reference_loss(o1b, o2b, lbl2)
    assert jnp.allclose(loss2, ref2, rtol=1e-4, atol=1e-4), (loss2, ref2)

    print("KERNEL_OK")
</pallas_src>

<mosaic_0001>
module attributes {stable_mosaic.version = 11 : i64} {
  func.func @_contrastive_loss_kernel(%arg0: i32, %arg1: i32, %arg2: memref<8x32xf32, #tpu.memory_space<vmem>>, %arg3: memref<8x32xf32, #tpu.memory_space<vmem>>, %arg4: memref<8x1xf32, #tpu.memory_space<vmem>>, %arg5: memref<1x1x1xf32, #tpu.memory_space<vmem>>) attributes {dimension_semantics = [#tpu.dimension_semantics<parallel>, #tpu.dimension_semantics<arbitrary>], iteration_bounds = array<i64: 2, 2>, scalar_prefetch = 0 : i64, scratch_operands = 0 : i64, tpu.core_type = #tpu.core_type<tc>, window_params = [{transform_indices = @transform_0, window_bounds = array<i64: 8, 32>}, {transform_indices = @transform_1, window_bounds = array<i64: 8, 32>}, {transform_indices = @transform_2, window_bounds = array<i64: 8, 1>}, {transform_indices = @transform_3, window_bounds = array<i64: 1, 1, 1>}]} {
    %c0_i32 = arith.constant 0 : i32
    %0 = arith.cmpi eq, %arg1, %c0_i32 : i32
    %1 = arith.extui %0 : i1 to i32
    %c0_i32_0 = arith.constant 0 : i32
    %2 = arith.cmpi ne, %1, %c0_i32_0 : i32
    scf.if %2 {
      %cst_17 = arith.constant 0.000000e+00 : f32
      %40 = vector.broadcast %cst_17 : f32 to vector<1x1x1xf32>
      %c0_18 = arith.constant 0 : index
      %c0_19 = arith.constant 0 : index
      %c0_20 = arith.constant 0 : index
      %41 = vector.load %arg5[%c0_18, %c0_19, %c0_20] : memref<1x1x1xf32, #tpu.memory_space<vmem>>, vector<1x1x1xf32>
      tpu.vector_store %arg5[%c0_18, %c0_19, %c0_20], %40 {strides = array<i32>} : memref<1x1x1xf32, #tpu.memory_space<vmem>>, vector<1x1x1xf32>,
    } else {
    }
    %c0 = arith.constant 0 : index
    %c0_1 = arith.constant 0 : index
    %3 = vector.load %arg2[%c0, %c0_1] : memref<8x32xf32, #tpu.memory_space<vmem>>, vector<8x32xf32>
    %c0_2 = arith.constant 0 : index
    %c0_3 = arith.constant 0 : index
    %4 = vector.load %arg3[%c0_2, %c0_3] : memref<8x32xf32, #tpu.memory_space<vmem>>, vector<8x32xf32>
    %c0_4 = arith.constant 0 : index
    %c0_5 = arith.constant 0 : index
    %5 = vector.load %arg4[%c0_4, %c0_5] : memref<8x1xf32, #tpu.memory_space<vmem>>, vector<8x1xf32>
    %6 = arith.subf %3, %4 : vector<8x32xf32>
    %cst = arith.constant 9.99999997E-7 : f32
    %7 = vector.broadcast %cst : f32 to vector<8x32xf32>
    %8 = arith.addf %6, %7 : vector<8x32xf32>
    %9 = arith.mulf %8, %8 : vector<8x32xf32>
    %cst_6 = arith.constant dense<0.000000e+00> : vector<8xf32>
    %10 = vector.multi_reduction <add>, %9, %cst_6 [1] : vector<8x32xf32> to vector<8xf32>
    %11 = vector.shape_cast %10 : vector<8xf32> to vector<8x1xf32>
    %12 = math.sqrt %11 : vector<8x1xf32>
    %cst_7 = arith.constant 2.000000e+00 : f32
    %13 = vector.broadcast %cst_7 : f32 to vector<8x1xf32>
    %14 = arith.subf %13, %12 : vector<8x1xf32>
    %cst_8 = arith.constant 0.000000e+00 : f32
    %15 = vector.broadcast %cst_8 : f32 to vector<8x1xf32>
    %16 = arith.maximumf %14, %15 : vector<8x1xf32>
    %17 = arith.mulf %16, %16 : vector<8x1xf32>
    %18 = arith.subf %17, %11 : vector<8x1xf32>
    %19 = arith.mulf %5, %18 : vector<8x1xf32>
    %20 = arith.addf %11, %19 : vector<8x1xf32>
    %c2_i32 = arith.constant 2 : i32
    %21 = arith.muli %arg0, %c2_i32 : i32
    %22 = arith.addi %21, %arg1 : i32
    %c8_i32 = arith.constant 8 : i32
    %23 = arith.muli %22, %c8_i32 : i32
    %24 = tpu.iota {dimensions = array<i32: 0>} : vector<8x1xi32>
    %25 = vector.broadcast %23 : i32 to vector<8x1xi32>
    %26 = arith.addi %25, %24 : vector<8x1xi32>
    %c20_i32 = arith.constant 20 : i32
    %27 = vector.broadcast %c20_i32 : i32 to vector<8x1xi32>
    %28 = arith.cmpi slt, %26, %27 : vector<8x1xi32>
    %cst_9 = arith.constant 0.000000e+00 : f32
    %29 = vector.broadcast %cst_9 : f32 to vector<8x1xf32>
    %30 = arith.select %28, %20, %29 : vector<8x1xi1>, vector<8x1xf32>
    %c0_10 = arith.constant 0 : index
    %c0_11 = arith.constant 0 : index
    %c0_12 = arith.constant 0 : index
    %31 = vector.load %arg5[%c0_10, %c0_11, %c0_12] : memref<1x1x1xf32, #tpu.memory_space<vmem>>, vector<1x1x1xf32>
    %32 = vector.shape_cast %30 : vector<8x1xf32> to vector<1x8x1xf32>
    %cst_13 = arith.constant dense<0.000000e+00> : vector<1xf32>
    %33 = vector.multi_reduction <add>, %32, %cst_13 [1, 2] : vector<1x8x1xf32> to vector<1xf32>
    %34 = vector.shape_cast %33 : vector<1xf32> to vector<1x1x1xf32>
    %35 = vector.extract %34[0, 0, 0] : f32 from vector<1x1x1xf32>
    %36 = vector.broadcast %35 : f32 to vector<1x1xf32>
    %37 = vector.shape_cast %36 : vector<1x1xf32> to vector<1x1x1xf32>
    %38 = arith.addf %31, %37 : vector<1x1x1xf32>
    %c0_14 = arith.constant 0 : index
    %c0_15 = arith.constant 0 : index
    %c0_16 = arith.constant 0 : index
    %39 = vector.load %arg5[%c0_14, %c0_15, %c0_16] : memref<1x1x1xf32, #tpu.memory_space<vmem>>, vector<1x1x1xf32>
    tpu.vector_store %arg5[%c0_14, %c0_15, %c0_16], %38 {strides = array<i32>} : memref<1x1x1xf32, #tpu.memory_space<vmem>>, vector<1x1x1xf32>,
    return
  }
  func.func @transform_0(%arg0: i32, %arg1: i32) -> (i32, i32) {
    %c2_i32 = arith.constant 2 : i32
    %0 = arith.muli %arg0, %c2_i32 : i32
    %1 = arith.addi %0, %arg1 : i32
    %c2_i32_0 = arith.constant 2 : i32
    %2 = arith.minsi %1, %c2_i32_0 : i32
    %c0_i32 = arith.constant 0 : i32
    %c0_i32_1 = arith.constant 0 : i32
    return %2, %c0_i32 : i32, i32
  }
  func.func @transform_1(%arg0: i32, %arg1: i32) -> (i32, i32) {
    %c2_i32 = arith.constant 2 : i32
    %0 = arith.muli %arg0, %c2_i32 : i32
    %1 = arith.addi %0, %arg1 : i32
    %c2_i32_0 = arith.constant 2 : i32
    %2 = arith.minsi %1, %c2_i32_0 : i32
    %c0_i32 = arith.constant 0 : i32
    %c0_i32_1 = arith.constant 0 : i32
    return %2, %c0_i32 : i32, i32
  }
  func.func @transform_2(%arg0: i32, %arg1: i32) -> (i32, i32) {
    %c2_i32 = arith.constant 2 : i32
    %0 = arith.muli %arg0, %c2_i32 : i32
    %1 = arith.addi %0, %arg1 : i32
    %c2_i32_0 = arith.constant 2 : i32
    %2 = arith.minsi %1, %c2_i32_0 : i32
    %c0_i32 = arith.constant 0 : i32
    %c0_i32_1 = arith.constant 0 : i32
    return %2, %c0_i32 : i32, i32
  }
  func.func @transform_3(%arg0: i32, %arg1: i32) -> (i32, i32, i32) {
    %c0_i32 = arith.constant 0 : i32
    %c0_i32_0 = arith.constant 0 : i32
    %c0_i32_1 = arith.constant 0 : i32
    return %arg0, %c0_i32, %c0_i32_0 : i32, i32, i32
  }
}

</mosaic_0001>

<bundles_post_ra>
// kernel: tpu_custom_call.1
= control target key start
LH: loop header
LB: loop body
LE: loop exit
PB: predicated region body
PF: predicated region fallthrough
CT: control target
= control target key end

     0   :  { %8 = vsyncpa [#allocation3], 0  ;;  %s844_s0 = inlined_call_operand.vmem [shape: f32[20,32], index: 0, kind: input, shape index: {}]   ;;  %s845_s1 = inlined_call_operand.hbm [shape: f32[20,32], index: 1, kind: input, shape index: {}]   ;;  %s846_s2 = inlined_call_operand.vmem [shape: f32[20,1], index: 2, kind: input, shape index: {}]   ;;  %s847_s3 = inlined_call_operand.vmem [shape: f32[2,1,1], index: 3, kind: output, shape index: {}]  }
   0x1   :  { %10 = vsyncpa [#allocation3 + $0x1], 0  ;;  %s676_s12 = smov 0   ;;  %s678_s13 = smov 0  }
   0x2   :  { %s680_s14 = smov 0   ;;  %s682_s15 = smov 0  }
   0x3   :  { %s684_s16 = smov 0   ;;  %s686_s17 = smov 0  }
   0x4   :  { %s688_s18 = smov 0   ;;  %s690_s19 = smov 0  }
   0x5 LB: > { %s450_s20 = sadd.s32 4294967295, %s652_s19   ;;  %s25_s21 = sadd.s32 1, %s644_s17  ;;  %s652_s19 = sphi %s690_s19, %s16_s19   ;;  %s648_s18 = sphi %s688_s18, %s859_s18   ;;  %s644_s17 = sphi %s686_s17, %s858_s17   ;;  %s640_s16 = sphi %s684_s16, %s857_s16   ;;  %s636_s15 = sphi %s682_s15, %s856_s15   ;;  %s632_s14 = sphi %s680_s14, %s855_s14   ;;  %s628_s13 = sphi %s678_s13, %s854_s13   ;;  %s624_s12 = sphi %s676_s12, %s853_s12  }
   0x6   : > { %p26_p0 = scmp.ge.s32.totalorder %s25_s21, 2  ;;  %s28_s22 = sadd.s32 1, %s648_s18 }
   0x7   : > { %s454_s23 = sshll.u32 %s648_s18, 1  ;;  %s77_s24 = sadd.s32 1, %s632_s14 }
   0x8   : > { %s861_s21 = smov (%p26_p0, %s25_s21), 0  ;;  %s863_s22 = smov (!%p26_p0, %s28_s22), %s648_s18 }
   0x9   : > { %s67_s25 = sadd.s32 %s644_s17, %s454_s23  ;;  %p84_p1 = scmp.ne.s32.totalorder %s632_s14, %s628_s13 }
   0xa   : > { %p30_p2 = scmp.ge.s32.totalorder %s863_s22, 2  ;;  %p68_p3 = scmp.lt.s32.totalorder %s67_s25, 2 }
   0xb   : > { %p85_p4 = scmp.eq.s32.totalorder %s652_s19, 0  ;;  %p90_p5 = scmp.ne.s32.totalorder %s628_s13, %s624_s12 }
   0xc   : > { %s865_s22 = smov (%p30_p2, %s863_s22), 0  ;;  %s867_s25 = smov (!%p68_p3, %s67_s25), 2 }
   0xd   : > { %s455_s26 = sshll.u32 %s865_s22, 1  ;;  %p730_p6 = por %p85_p4, %p84_p1 }
   0xe   : > { %s71_s28 = sadd.s32 %s455_s26, %s861_s21  ;;  %p91_p7 = scmp.eq.s32.totalorder %s450_s20, 0 }
   0xf   : > { %p72_p8 = scmp.lt.s32.totalorder %s71_s28, 2  ;;  %p488_p10 = scmp.lt.s32.totalorder %s652_s19, 4 }
  0x10   : > { %p735_p9 = por %p91_p7, %p90_p5  ;;  %s189_s30 = sand.u32 1, %s632_s14  }
  0x11   : > { %s869_s28 = smov (!%p72_p8, %s71_s28), 2  ;;  %s462_s4 = sshll.u32 %s867_s25, 7 }
  0x12   : > { %s74_s5 = ssub.s32 %s867_s25, %s869_s28  ;;  %s460_s6 = sshll.u32 %s189_s30, 3 }
  0x13   : > { %p75_p11 = scmp.eq.s32.totalorder %s74_s5, 0  ;;  %s744_s9 = scalar_lea.hbm %s845_s1, %s462_s4 }
  0x14   : > { %s193_s11 = scalar_lea.vmem [#allocation2], %s460_s6  ;;  %p751_p12 = pnand %p488_p10, %p730_p6 }
  0x15   : > { %s747_s10 = scalar_select %p75_p11, %s632_s14, %s77_s24  }
  0x16   : > { %s204_s12 = sshll.u32 %s193_s11, 4  ;;  %s190_s23 = scalar_lea.sflag [#allocation3], %s189_s30  ;;  %s755_s12 = int_to_ptr.vmem [resolvable:$true] %s204_s12 }
  0x17   : > { %s556_s25 = scalar_lea.hbm %s744_s9, 128  ;;  %p558_p2 = pneg %p751_p12 }
  0x18   : > { %p557_p1 = scmp.ne.s32.totalorder %s744_s9, %s556_s25  ;;  %s561_s27 = scalar_lea.hbm %s845_s1, 384 }
  0x19   : > { %p562_p5 = scmp.lt.u32.totalorder %s744_s9, %s845_s1  ;;  %p563_p6 = scmp.lt.u32.totalorder %s561_s27, %s556_s25 }
  0x1a   : > { %p559_p3 = pnand %p558_p2, %p557_p1  ;;  %p565_p8 = scmp.lt.u32.totalorder %s556_s25, %s744_s9 }
  0x1b   : > { %p564_p7 = por %p563_p6, %p562_p5 }
  0x1c   : > { %p560_p4 = pneg %p559_p3 }
  0x1d   : > { %p566_p10 = por %p565_p8, %p564_p7 }
  0x1f   : > { %p567_p11 = pnand %p566_p10, %p560_p4 }
  0x21   : > { %570 = shalt.err (!%p567_p11)
}
  0x22   : > { %s571_s30 = scalar_lea.vmem %s755_s12, 128  ;;  %s654_s5 = smov [#allocation2]  }
  0x23   : > { %p572_p1 = scmp.ne.s32.totalorder %s755_s12, %s571_s30  ;;  %s576_s6 = sshll.u32 %s654_s5, 4  ;;  %s577_s6 = int_to_ptr.vmem [resolvable:$false] %s576_s6 }
  0x24   : > { %s578_s7 = scalar_lea.vmem %s577_s6, 256  ;;  %p579_p0 = scmp.lt.s32.totalorder %s755_s12, %s577_s6 }
  0x25   : > { %p574_p3 = pnand %p572_p1, %p558_p2  ;;  %p580_p5 = scmp.lt.s32.totalorder %s578_s7, %s571_s30 }
  0x27   : > { %p575_p13 = pneg %p574_p3  ;;  %p581_p6 = por %p580_p5, %p579_p0 }
  0x29   : > { %p582_p7 = pnand %p581_p6, %p575_p13 }
  0x2b   : > { %585 = shalt.err (!%p582_p7)
}
  0x2c   : > { %487 = dma.hbm_to_vmem [thread:$0]  (!%p751_p12), %s744_s9, 128, %s755_s12, %s190_s23  }
  0x2d   : > { %p851_p4 = scmp.lt.s32.totalorder %s652_s19, 5  ;;  %p852_p8 = scmp.ge.s32.totalorder %s652_s19, 1 }
  0x2f   : > { %p225_p2 = pnand %p852_p8, %p851_p4 }
  0x30   : > { %s230_s8 = sand.u32 (!%p225_p2), 1, %s628_s13  }
  0x31   : > { %228 = sbr.rel (%p225_p2) target bundleno = 455 (0x1c7), region = 32  ;;  %s464_s11 = sshll.u32 (!%p225_p2), %s230_s8, 3 }
  0x32   : > { %s231_s25 = scalar_lea.sflag (!%p225_p2), [#allocation3], %s230_s8  ;;  %s234_s24 = scalar_lea.vmem (!%p225_p2), [#allocation2], %s464_s11 }
  0x38   : > { %619 = dma.done.wait (%p735_p9), %s231_s25, 128  }
  0x39   : > { %621 = vsyncadd (%p735_p9), %s231_s25, 4294967168  ;;  %s465_s9 = sshll.u32 %s640_s16, 1  ;;  %p299_p12 = scmp.lt.s32.totalorder %s640_s16, 1 }
  0x3a   : > { %s796_s12 = sadd.s32 %s636_s15, %s465_s9  ;;  %p475_p9 = scmp.ne.s32.totalorder %s636_s15, 0 }
  0x3b   : > { %p273_p13 = scmp.lt.s32.totalorder %s796_s12, 2  ;;  %s871_s16 = smov (!%p299_p12, %s640_s16), 1  ;;  %vm306_vm0 = vcmask (!%p475_p9), 0   ;;  %v655_v0 = vmov (!%p475_p9), 0.0  }
  0x3c   : > { %s804_s27 = scalar_lea.vmem %s847_s3, %s871_s16  ;;  %305 = sbr.rel (%p475_p9) target bundleno = 67 (0x43), region = 40 }
  0x3d   : > { %s274_s20 = scalar_select %p273_p13, %s796_s12, 2 }
  0x3e   : > { %307 = vst.msk [vmem:[%s804_s27] sm:$0x1] (!%p475_p9), %vm306_vm0, %v655_v0 }
  0x3f   : > { %s873_s20 = smov (!%p273_p13, %s274_s20), 2 }
  0x40   : > { %s469_s29 = sshll.u32 %s873_s20, 3 }
  0x41   : > { %s278_s30 = scalar_lea.vmem %s844_s0, %s469_s29  ;;  %s812_s7 = scalar_lea.vmem %s846_s2, %s469_s29 }
  0x43 PF: > { %v308_v1 = vld [vmem:[%s278_s30] sm:$0xff]  ;;  %vm314_vm1 = vcmask 261120   ;;  %v334_v11 = vlaneseq  ;;  %s477_s15 = sshll.u32 %s796_s12, 3  ;;  %vm341_vm5 = vcmask 7168   ;;  %vm354_vm6 = vcmask 0  }
  0x44   : > { %v309_v2 = vld [vmem:[%s234_s24] sm:$0xff]  ;;  %v336_v17 = vstv %s477_s15 }
  0x45   : > { %v311_v3 = vsub.f32 %v308_v1, %v309_v2  ;;  %v335_v15 = vshrl.u32 %v334_v11, 7  ;;  %v310_v19 = vld [vmem:[%s812_s7] sm:$0xff] }
  0x46   : > { %v340_v33 = vld [vmem:[%s804_s27] sm:$0x1] }
  0x47   : > { %v312_v4 = vadd.f32 1e-06, %v311_v3  ;;  %v337_v20 = vadd.s32 %v336_v17, %v335_v15 }
  0x49   : > { %v313_v5 = vmul.f32 %v312_v4, %v312_v4  ;;  %vm338_vm4 = vcmp.lt.s32.totalorder %v337_v20, 20 }
  0x4b   : > { %v315_v6 = vsel %vm314_vm1, %v313_v5, 0.0 }
  0x4c   : > { %316 = vadd.xlane.f32.xlu0 %v315_v6 }
  0xd9   : > { %v317_v7 = vpop.xlane.xlu0 %316 }
  0xda   : > { %554 = vrsqrt.f32 %v317_v7  ;;  %vm320_vm2 = vcmp.eq.f32.partialorder %v317_v7, inf  ;;  %v323_v10 = vand.u32 2147483648, %v317_v7  ;;  %vm322_vm3 = vcmp.eq.f32.partialorder %v317_v7, 0.0 }
  0xe4   : > { %v555_v8 = vpop.eup %554 }
  0xe5   : > { %v319_v9 = vmul.f32 %v555_v8, %v317_v7 }
  0xe7   : > { %v321_v12 = vsel %vm320_vm2, %v317_v7, %v319_v9 }
  0xe8   : > { %v324_v13 = vsel %vm322_vm3, %v323_v10, %v321_v12 }
  0xe9   : > { %v325_v14 = vsub.f32 2.0, %v324_v13 }
  0xeb   : > { %v326_v16 = vmax.f32 %v325_v14, 0.0 }
  0xed   : > { %v327_v18 = vmul.f32 %v326_v16, %v326_v16 }
  0xef   : > { %v328_v21 = vsub.f32 %v327_v18, %v317_v7 }
  0xf1   : > { %v329_v22 = vmul.f32 %v328_v21, %v310_v19 }
  0xf3   : > { %v330_v23 = vadd.f32 %v329_v22, %v317_v7 }
  0xf5   : > { %v339_v24 = vsel %vm338_vm4, %v330_v23, 0.0 }
  0xf6   : > { %v342_v25 = vsel %vm341_vm5, %v339_v24, 0.0 }
  0xf7   : > { %343 = vadd.xlane.f32.xlu0 %v342_v25 }
 0x184   : > { %v344_v26 = vpop.xlane.xlu0 %343 }
 0x185   : > { %v345_v27 = vrot.slane %v344_v26, 4 }
 0x187   : > { %v346_v28 = vadd.f32 %v345_v27, %v344_v26 }
 0x189   : > { %v347_v29 = vrot.slane %v346_v28, 2 }
 0x18b   : > { %v348_v30 = vadd.f32 %v347_v29, %v346_v28 }
 0x18d   : > { %v349_v31 = vrot.slane %v348_v30, 1 }
 0x18f   : > { %v350_v32 = vadd.f32 %v349_v31, %v348_v30 }
 0x191   : > { %480 = vpush %v350_v32 }
 0x1c2   : > { %s481_s16 = spop %480 }
 0x1c3   : > { %v352_v34 = vstv %s481_s16 }
 0x1c4   : > { %v353_v35 = vadd.f32 %v352_v34, %v340_v33 }
 0x1c6   : > { %355 = vst.msk [vmem:[%s804_s27] sm:$0x1] %vm354_vm6, %v353_v35 }
 0x1c7 PF: > { %s16_s19 = sadd.s32 1, %s652_s19   ;;  %s853_s12 = smov %s628_s13 }
 0x1c8   : > { %p13_p0 = scmp.ge.s32.totalorder %s16_s19, 6   ;;  %s854_s13 = smov %s632_s14 }
 0x1c9   : > { %s855_s14 = smov %s747_s10  ;;  %s856_s15 = smov %s644_s17 }
 0x1ca   : > { %s857_s16 = smov %s648_s18  ;;  %s858_s17 = smov %s861_s21 }
 0x1cb   : > { %s859_s18 = smov %s865_s22  ;;  %15 = sbr.rel (!%p13_p0) target bundleno = 5 (0x5), region = 82 }
 0x1d2   :  { %373 = vsyncpa [#allocation3], 1 }
 0x1d3   :  { %375 = vsyncpa [#allocation3 + $0x1], 1 }

</bundles_post_ra>
